<compile_context>
chip_gen: v5e
topology: v5e:2x2
jax: 0.10.0
libtpu: 0.0.40
codegen_flags: <defaults>
</compile_context>

<pallas_src>
import functools

import jax
import jax.numpy as jnp
from jax.experimental import pallas as pl
from jax.experimental.pallas import tpu as pltpu

EPS = 1e-6


def _round_up(x, m):
    return (x + m - 1) // m * m


def _vmem_capacity_bytes():
    try:
        return int(pltpu.get_tpu_info().vmem_capacity_bytes)
    except Exception:
        return 64 << 20  # conservative (v7x-sized) fallback


def _sublayer_kernel(x_ref, w_ref, b_ref, g_ref, beta_ref, o_ref, *, h_real):
    """Fused pre-LN -> Linear -> residual for one (row tile, column tile).

    x_ref     : [TM, Hp]  input rows (Hp = H padded to a multiple of 128)
    w_ref     : [Hp, TN]  bf16 weight column tile (x @ w layout)
    b_ref     : [1, TN]   bias column tile (f32)
    g_ref     : [1, Hp]   LayerNorm scale a_2 (f32, zero in padded columns)
    beta_ref  : [1, Hp]   LayerNorm shift b_2 (f32, zero in padded columns)
    o_ref     : [TM, TN]  output tile
    """
    j = pl.program_id(1)
    tn = o_ref.shape[-1]

    x = x_ref[...].astype(jnp.float32)
    hp = x.shape[-1]

    # --- LayerNorm (annotated-transformer style: unbiased std, eps on std) ---
    # Padded x columns are zero, so the sum is over the real columns already;
    # divide by the real H.  Mask the centered values so padded columns do not
    # contribute to the variance and stay exactly zero in x_norm.
    mean = jnp.sum(x, axis=-1, keepdims=True) * jnp.float32(1.0 / h_real)
    if hp == h_real:
        centered = x - mean
    else:
        col = jax.lax.broadcasted_iota(jnp.int32, x.shape, 1)
        centered = jnp.where(col < h_real, x - mean, 0.0)
    # torch.Tensor.std() is the unbiased estimator (divide by N-1).
    var = jnp.sum(centered * centered, axis=-1, keepdims=True) * jnp.float32(
        1.0 / (h_real - 1))
    # Divide -> EUP reciprocal (separate VLIW slot, effectively free).
    inv = pl.reciprocal(jnp.sqrt(var) + EPS, approx=True)
    x_norm = g_ref[...] * (centered * inv) + beta_ref[...]
    # TODO(synk): optional inference-only folding of gamma into the weight rows
    # and (beta @ W + b) into the bias if VALU ever becomes the binding slot.

    # --- sublayer: Linear on the MXU (bf16 operands, f32 accumulate) ---
    y = jnp.dot(x_norm.astype(w_ref.dtype), w_ref[...],
                preferred_element_type=jnp.float32)
    y = y + b_ref[...]

    # --- dropout: inference mode => identity ---
    # TODO(synk): train-mode dropout would seed pltpu.prng_seed per grid step
    # and build a Bernoulli keep-mask from pltpu.prng_random_bits, scaled 1/(1-p).

    # --- residual: re-read the needed column slice of the resident x block ---
    # (don't keep the pre-LN f32 copy of x live across the MXU call).
    col0 = pl.multiple_of(j * tn, 128)
    x_res = x_ref[:, pl.ds(col0, tn)].astype(jnp.float32)
    o_ref[...] = (x_res + y).astype(o_ref.dtype)


def prepare_sublayer_params(w, b, gamma, beta):
    """One-time parameter prep: lane-dense zero-padding + bf16 weight.

    Do this at module-init time, NOT per forward call (avoids re-reading the
    full f32 weight from HBM on every invocation just to cast it).
    """
    H = w.shape[0]
    Hp = _round_up(H, 128)
    pad = Hp - H
    w_p = jnp.pad(w, ((0, pad), (0, pad))).astype(jnp.bfloat16)
    b_p = jnp.pad(b, (0, pad)).reshape(1, Hp).astype(jnp.float32)
    g_p = jnp.pad(gamma, (0, pad)).reshape(1, Hp).astype(jnp.float32)
    be_p = jnp.pad(beta, (0, pad)).reshape(1, Hp).astype(jnp.float32)
    return w_p, b_p, g_p, be_p


def sublayer_connection(x, w_p, b_p, g_p, be_p, *, tm=None):
    """x: [B, S, H] f32. Params from prepare_sublayer_params (padded to Hp).

    Returns x + Linear(LayerNorm(x))   (dropout in eval mode).
    """
    B, S, H = x.shape
    Hp = w_p.shape[0]
    M = B * S

    # ---- generation-aware budgets ----
    cap = _vmem_capacity_bytes()
    if cap > (96 << 20):          # v5e / v6e: 128 MiB physical VMEM
        limit_cap = 100 << 20
        tm_default = 512
    else:                         # v7x: 64 MiB per TensorCore
        limit_cap = 56 << 20
        tm_default = 256
    if tm is not None:
        tm_default = tm

    # ---- row tile: 16-aligned (bf16 sublane packing feeding the MXU); for
    # small M, split into two tiles where possible so v7x megacore gets work.
    if M > tm_default:
        TM = tm_default
    else:
        TM = min(_round_up(M, 16), max(16, _round_up((M + 1) // 2, 16)))
    Mp = _round_up(M, TM)

    # ---- weight-column (N) tiling: only if the resident weight + pipelined
    # tiles + f32 intermediates would blow the per-generation VMEM budget.
    def _footprint(tn):
        n_col_ = Hp // tn
        w_bufs = 1 if n_col_ == 1 else 2
        return (2 * TM * Hp * 4          # x tiles (double-buffered, f32)
                + 2 * TM * tn * 4        # out tiles (double-buffered, f32)
                + w_bufs * Hp * tn * 2   # bf16 weight tile(s)
                + 4 * TM * Hp * 4        # kernel f32 intermediates
                + (6 << 20))             # params + compiler scratch headroom

    TN = Hp
    while TN % 256 == 0 and _footprint(TN) > limit_cap:
        TN //= 2
    n_col = Hp // TN
    vmem_limit = int(min(max(_footprint(TN), 16 << 20), limit_cap))

    # ---- pad activations to the lane-dense slab ----
    x2d = x.reshape(M, H)
    if (Mp, Hp) != (M, H):
        x2d = jnp.pad(x2d, ((0, Mp - M), (0, Hp - H)))

    grid = (Mp // TM, n_col)

    def _build_specs(single_buffer_params):
        x_spec = pl.BlockSpec((TM, Hp), lambda i, j: (i, 0))
        if single_buffer_params and n_col == 1:
            w_spec = pl.BlockSpec((Hp, TN), lambda i, j: (0, j),
                                  pipeline_mode=pl.Buffered(1))
            b_spec = pl.BlockSpec((1, TN), lambda i, j: (0, j),
                                  pipeline_mode=pl.Buffered(1))
        else:
            w_spec = pl.BlockSpec((Hp, TN), lambda i, j: (0, j))
            b_spec = pl.BlockSpec((1, TN), lambda i, j: (0, j))
        if single_buffer_params:
            g_spec = pl.BlockSpec((1, Hp), lambda i, j: (0, 0),
                                  pipeline_mode=pl.Buffered(1))
            be_spec = pl.BlockSpec((1, Hp), lambda i, j: (0, 0),
                                   pipeline_mode=pl.Buffered(1))
        else:
            g_spec = pl.BlockSpec((1, Hp), lambda i, j: (0, 0))
            be_spec = pl.BlockSpec((1, Hp), lambda i, j: (0, 0))
        out_spec = pl.BlockSpec((TM, TN), lambda i, j: (i, j))
        return [x_spec, w_spec, b_spec, g_spec, be_spec], out_spec

    kernel = functools.partial(_sublayer_kernel, h_real=H)

    def _call(single_buffer_params):
        in_specs, out_spec = _build_specs(single_buffer_params)
        return pl.pallas_call(
            kernel,
            out_shape=jax.ShapeDtypeStruct((Mp, Hp), x.dtype),
            grid=grid,
            in_specs=in_specs,
            out_specs=out_spec,
            # Output exactly shadows x's (padded) buffer; only aliased when
            # each grid step reads/writes the same disjoint row tile.
            input_output_aliases={0: 0} if n_col == 1 else {},
            compiler_params=pltpu.CompilerParams(
                dimension_semantics=("parallel", "parallel"),
                vmem_limit_bytes=vmem_limit),
        )(x2d, w_p, b_p, g_p, be_p)

    try:
        out2d = _call(single_buffer_params=True)
    except Exception:
        # Fallback for JAX versions where Buffered(1) single-buffering of
        # grid-invariant operands is not supported: identical semantics,
        # default double-buffering.
        out2d = _call(single_buffer_params=False)

    return out2d[:M, :H].reshape(B, S, H)


def reference(x, w, b, gamma, beta):
    """Pure-JAX f32 reference with identical semantics (eval-mode dropout)."""
    mean = jnp.mean(x, axis=-1, keepdims=True)
    c = x - mean
    h = x.shape[-1]
    std = jnp.sqrt(jnp.sum(c * c, axis=-1, keepdims=True) / (h - 1))
    xn = gamma * c / (std + EPS) + beta
    y = jnp.einsum("bsh,hk->bsk", xn, w) + b
    return x + y


if __name__ == "__main__":
    B, S, H = 2, 8, 32          # batch, seq, hidden (size == H)
    key = jax.random.PRNGKey(0)
    kx, kw, kb = jax.random.split(key, 3)

    x = jax.random.normal(kx, (B, S, H), dtype=jnp.float32)

    # LayerNorm init: a_2 = ones, b_2 = zeros.
    gamma = jnp.ones((H,), dtype=jnp.float32)
    beta = jnp.zeros((H,), dtype=jnp.float32)
    # Sublayer = Linear(H, H); weight stored so the kernel computes x @ w.
    w = jax.random.normal(kw, (H, H), dtype=jnp.float32) * (1.0 / jnp.sqrt(H))
    b = jax.random.normal(kb, (H,), dtype=jnp.float32) * 0.02
    # dropout p = 0.1 (unused in inference mode).

    # Parameter prep (lane-dense zero-pad + bf16 weight) happens ONCE.
    w_p, b_p, g_p, be_p = prepare_sublayer_params(w, b, gamma, beta)

    out = jax.block_until_ready(sublayer_connection(x, w_p, b_p, g_p, be_p))
    ref = reference(x, w, b, gamma, beta)

    assert out.shape == (B, S, H)
    # bf16 MXU operands + EUP approx reciprocal => tolerance loose enough for
    # the reduced-precision matmul path.
    assert jnp.allclose(out, ref, atol=3e-2, rtol=3e-2), "mismatch vs reference"

    print("KERNEL_OK")
</pallas_src>

<mosaic_0001>
module attributes {stable_mosaic.version = 11 : i64} {
  func.func @_sublayer_kernel(%arg0: i32, %arg1: i32, %arg2: memref<16x128xf32, #tpu.memory_space<vmem>>, %arg3: memref<128x128xbf16, #tpu.memory_space<vmem>>, %arg4: memref<1x128xf32, #tpu.memory_space<vmem>>, %arg5: memref<1x128xf32, #tpu.memory_space<vmem>>, %arg6: memref<1x128xf32, #tpu.memory_space<vmem>>, %arg7: memref<16x128xf32, #tpu.memory_space<vmem>>) attributes {dimension_semantics = [#tpu.dimension_semantics<parallel>, #tpu.dimension_semantics<parallel>], iteration_bounds = array<i64: 1, 1>, scalar_prefetch = 0 : i64, scratch_operands = 0 : i64, tpu.core_type = #tpu.core_type<tc>, window_params = [{transform_indices = @transform_0, window_bounds = array<i64: 16, 128>}, {pipeline_mode = #tpu.pipeline_mode<synchronous>, transform_indices = @transform_1, window_bounds = array<i64: 128, 128>}, {pipeline_mode = #tpu.pipeline_mode<synchronous>, transform_indices = @transform_2, window_bounds = array<i64: 1, 128>}, {pipeline_mode = #tpu.pipeline_mode<synchronous>, transform_indices = @transform_3, window_bounds = array<i64: 1, 128>}, {pipeline_mode = #tpu.pipeline_mode<synchronous>, transform_indices = @transform_4, window_bounds = array<i64: 1, 128>}, {transform_indices = @transform_5, window_bounds = array<i64: 16, 128>}]} {
    %c0 = arith.constant 0 : index
    %c0_0 = arith.constant 0 : index
    %0 = vector.load %arg2[%c0, %c0_0] : memref<16x128xf32, #tpu.memory_space<vmem>>, vector<16x128xf32>
    %cst = arith.constant dense<0.000000e+00> : vector<16xf32>
    %1 = vector.multi_reduction <add>, %0, %cst [1] : vector<16x128xf32> to vector<16xf32>
    %2 = vector.shape_cast %1 : vector<16xf32> to vector<16x1xf32>
    %cst_1 = arith.constant 3.125000e-02 : f32
    %3 = vector.broadcast %cst_1 : f32 to vector<16x1xf32>
    %4 = arith.mulf %2, %3 : vector<16x1xf32>
    %5 = tpu.iota {dimensions = array<i32: 1>} : vector<16x128xi32>
    %c32_i32 = arith.constant 32 : i32
    %6 = vector.broadcast %c32_i32 : i32 to vector<16x128xi32>
    %7 = arith.cmpi slt, %5, %6 : vector<16x128xi32>
    %8 = vector.broadcast %4 : vector<16x1xf32> to vector<16x128xf32>
    %9 = arith.subf %0, %8 : vector<16x128xf32>
    %cst_2 = arith.constant 0.000000e+00 : f32
    %10 = vector.broadcast %cst_2 : f32 to vector<16x128xf32>
    %11 = arith.select %7, %9, %10 : vector<16x128xi1>, vector<16x128xf32>
    %12 = arith.mulf %11, %11 : vector<16x128xf32>
    %cst_3 = arith.constant dense<0.000000e+00> : vector<16xf32>
    %13 = vector.multi_reduction <add>, %12, %cst_3 [1] : vector<16x128xf32> to vector<16xf32>
    %14 = vector.shape_cast %13 : vector<16xf32> to vector<16x1xf32>
    %cst_4 = arith.constant 0.0322580636 : f32
    %15 = vector.broadcast %cst_4 : f32 to vector<16x1xf32>
    %16 = arith.mulf %14, %15 : vector<16x1xf32>
    %17 = math.sqrt %16 : vector<16x1xf32>
    %cst_5 = arith.constant 9.99999997E-7 : f32
    %18 = vector.broadcast %cst_5 : f32 to vector<16x1xf32>
    %19 = arith.addf %17, %18 : vector<16x1xf32>
    %20 = tpu.reciprocal %19 {approx = true} : vector<16x1xf32> -> vector<16x1xf32>
    %c0_6 = arith.constant 0 : index
    %c0_7 = arith.constant 0 : index
    %21 = vector.load %arg5[%c0_6, %c0_7] : memref<1x128xf32, #tpu.memory_space<vmem>>, vector<1x128xf32>
    %22 = vector.broadcast %20 : vector<16x1xf32> to vector<16x128xf32>
    %23 = arith.mulf %11, %22 : vector<16x128xf32>
    %24 = vector.broadcast %21 : vector<1x128xf32> to vector<16x128xf32>
    %25 = arith.mulf %24, %23 : vector<16x128xf32>
    %c0_8 = arith.constant 0 : index
    %c0_9 = arith.constant 0 : index
    %26 = vector.load %arg6[%c0_8, %c0_9] : memref<1x128xf32, #tpu.memory_space<vmem>>, vector<1x128xf32>
    %27 = vector.broadcast %26 : vector<1x128xf32> to vector<16x128xf32>
    %28 = arith.addf %25, %27 : vector<16x128xf32>
    %29 = arith.truncf %28 : vector<16x128xf32> to vector<16x128xbf16>
    %c0_10 = arith.constant 0 : index
    %c0_11 = arith.constant 0 : index
    %30 = vector.load %arg3[%c0_10, %c0_11] : memref<128x128xbf16, #tpu.memory_space<vmem>>, vector<128x128xbf16>
    %cst_12 = arith.constant dense<0.000000e+00> : vector<16x128xf32>
    %31 = tpu.matmul %29, %30, %cst_12 {dimension_numbers = #tpu.dot_dimension_numbers<[1], [0], [0], [1], [0, 0, 1, 1], [], []>} : vector<16x128xbf16>, vector<128x128xbf16>, vector<16x128xf32> -> vector<16x128xf32>
    %c0_13 = arith.constant 0 : index
    %c0_14 = arith.constant 0 : index
    %32 = vector.load %arg4[%c0_13, %c0_14] : memref<1x128xf32, #tpu.memory_space<vmem>>, vector<1x128xf32>
    %33 = vector.broadcast %32 : vector<1x128xf32> to vector<16x128xf32>
    %34 = arith.addf %31, %33 : vector<16x128xf32>
    %c128_i32 = arith.constant 128 : i32
    %35 = arith.muli %arg1, %c128_i32 : i32
    %36 = tpu.assume_multiple %35, 128 : i32
    %c0_15 = arith.constant 0 : index
    %37 = arith.index_cast %36 : i32 to index
    %38 = vector.load %arg2[%c0_15, %37] : memref<16x128xf32, #tpu.memory_space<vmem>>, vector<16x128xf32>
    %39 = arith.addf %38, %34 : vector<16x128xf32>
    %c0_16 = arith.constant 0 : index
    %c0_17 = arith.constant 0 : index
    %40 = vector.load %arg7[%c0_16, %c0_17] : memref<16x128xf32, #tpu.memory_space<vmem>>, vector<16x128xf32>
    tpu.vector_store %arg7[%c0_16, %c0_17], %39 {strides = array<i32>} : memref<16x128xf32, #tpu.memory_space<vmem>>, vector<16x128xf32>,
    return
  }
  func.func @transform_0(%arg0: i32, %arg1: i32) -> (i32, i32) {
    %c0_i32 = arith.constant 0 : i32
    %c0_i32_0 = arith.constant 0 : i32
    return %arg0, %c0_i32 : i32, i32
  }
  func.func @transform_1(%arg0: i32, %arg1: i32) -> (i32, i32) {
    %c0_i32 = arith.constant 0 : i32
    %c0_i32_0 = arith.constant 0 : i32
    return %c0_i32, %arg1 : i32, i32
  }
  func.func @transform_2(%arg0: i32, %arg1: i32) -> (i32, i32) {
    %c0_i32 = arith.constant 0 : i32
    %c0_i32_0 = arith.constant 0 : i32
    return %c0_i32, %arg1 : i32, i32
  }
  func.func @transform_3(%arg0: i32, %arg1: i32) -> (i32, i32) {
    %c0_i32 = arith.constant 0 : i32
    %c0_i32_0 = arith.constant 0 : i32
    %c0_i32_1 = arith.constant 0 : i32
    return %c0_i32, %c0_i32_0 : i32, i32
  }
  func.func @transform_4(%arg0: i32, %arg1: i32) -> (i32, i32) {
    %c0_i32 = arith.constant 0 : i32
    %c0_i32_0 = arith.constant 0 : i32
    %c0_i32_1 = arith.constant 0 : i32
    return %c0_i32, %c0_i32_0 : i32, i32
  }
  func.func @transform_5(%arg0: i32, %arg1: i32) -> (i32, i32) {
    %c0_i32 = arith.constant 0 : i32
    return %arg0, %arg1 : i32, i32
  }
}

module attributes {stable_mosaic.version = 11 : i64} {
  func.func @_sublayer_kernel(%arg0: i32, %arg1: i32, %arg2: memref<16x128xf32, #tpu.memory_space<vmem>>, %arg3: memref<128x128xbf16, #tpu.memory_space<vmem>>, %arg4: memref<1x128xf32, #tpu.memory_space<vmem>>, %arg5: memref<1x128xf32, #tpu.memory_space<vmem>>, %arg6: memref<1x128xf32, #tpu.memory_space<vmem>>, %arg7: memref<16x128xf32, #tpu.memory_space<vmem>>) attributes {dimension_semantics = [#tpu.dimension_semantics<parallel>, #tpu.dimension_semantics<parallel>], iteration_bounds = array<i64: 1, 1>, scalar_prefetch = 0 : i64, scratch_operands = 0 : i64, tpu.core_type = #tpu.core_type<tc>, window_params = [{transform_indices = @transform_0, window_bounds = array<i64: 16, 128>}, {transform_indices = @transform_1, window_bounds = array<i64: 128, 128>}, {transform_indices = @transform_2, window_bounds = array<i64: 1, 128>}, {pipeline_mode = #tpu.pipeline_mode<synchronous>, transform_indices = @transform_3, window_bounds = array<i64: 1, 128>}, {pipeline_mode = #tpu.pipeline_mode<synchronous>, transform_indices = @transform_4, window_bounds = array<i64: 1, 128>}, {transform_indices = @transform_5, window_bounds = array<i64: 16, 128>}]} {
    %c0 = arith.constant 0 : index
    %c0_0 = arith.constant 0 : index
    %0 = vector.load %arg2[%c0, %c0_0] : memref<16x128xf32, #tpu.memory_space<vmem>>, vector<16x128xf32>
    %cst = arith.constant dense<0.000000e+00> : vector<16xf32>
    %1 = vector.multi_reduction <add>, %0, %cst [1] : vector<16x128xf32> to vector<16xf32>
    %2 = vector.shape_cast %1 : vector<16xf32> to vector<16x1xf32>
    %cst_1 = arith.constant 3.125000e-02 : f32
    %3 = vector.broadcast %cst_1 : f32 to vector<16x1xf32>
    %4 = arith.mulf %2, %3 : vector<16x1xf32>
    %5 = tpu.iota {dimensions = array<i32: 1>} : vector<16x128xi32>
    %c32_i32 = arith.constant 32 : i32
    %6 = vector.broadcast %c32_i32 : i32 to vector<16x128xi32>
    %7 = arith.cmpi slt, %5, %6 : vector<16x128xi32>
    %8 = vector.broadcast %4 : vector<16x1xf32> to vector<16x128xf32>
    %9 = arith.subf %0, %8 : vector<16x128xf32>
    %cst_2 = arith.constant 0.000000e+00 : f32
    %10 = vector.broadcast %cst_2 : f32 to vector<16x128xf32>
    %11 = arith.select %7, %9, %10 : vector<16x128xi1>, vector<16x128xf32>
    %12 = arith.mulf %11, %11 : vector<16x128xf32>
    %cst_3 = arith.constant dense<0.000000e+00> : vector<16xf32>
    %13 = vector.multi_reduction <add>, %12, %cst_3 [1] : vector<16x128xf32> to vector<16xf32>
    %14 = vector.shape_cast %13 : vector<16xf32> to vector<16x1xf32>
    %cst_4 = arith.constant 0.0322580636 : f32
    %15 = vector.broadcast %cst_4 : f32 to vector<16x1xf32>
    %16 = arith.mulf %14, %15 : vector<16x1xf32>
    %17 = math.sqrt %16 : vector<16x1xf32>
    %cst_5 = arith.constant 9.99999997E-7 : f32
    %18 = vector.broadcast %cst_5 : f32 to vector<16x1xf32>
    %19 = arith.addf %17, %18 : vector<16x1xf32>
    %20 = tpu.reciprocal %19 {approx = true} : vector<16x1xf32> -> vector<16x1xf32>
    %c0_6 = arith.constant 0 : index
    %c0_7 = arith.constant 0 : index
    %21 = vector.load %arg5[%c0_6, %c0_7] : memref<1x128xf32, #tpu.memory_space<vmem>>, vector<1x128xf32>
    %22 = vector.broadcast %20 : vector<16x1xf32> to vector<16x128xf32>
    %23 = arith.mulf %11, %22 : vector<16x128xf32>
    %24 = vector.broadcast %21 : vector<1x128xf32> to vector<16x128xf32>
    %25 = arith.mulf %24, %23 : vector<16x128xf32>
    %c0_8 = arith.constant 0 : index
    %c0_9 = arith.constant 0 : index
    %26 = vector.load %arg6[%c0_8, %c0_9] : memref<1x128xf32, #tpu.memory_space<vmem>>, vector<1x128xf32>
    %27 = vector.broadcast %26 : vector<1x128xf32> to vector<16x128xf32>
    %28 = arith.addf %25, %27 : vector<16x128xf32>
    %29 = arith.truncf %28 : vector<16x128xf32> to vector<16x128xbf16>
    %c0_10 = arith.constant 0 : index
    %c0_11 = arith.constant 0 : index
    %30 = vector.load %arg3[%c0_10, %c0_11] : memref<128x128xbf16, #tpu.memory_space<vmem>>, vector<128x128xbf16>
    %cst_12 = arith.constant dense<0.000000e+00> : vector<16x128xf32>
    %31 = tpu.matmul %29, %30, %cst_12 {dimension_numbers = #tpu.dot_dimension_numbers<[1], [0], [0], [1], [0, 0, 1, 1], [], []>} : vector<16x128xbf16>, vector<128x128xbf16>, vector<16x128xf32> -> vector<16x128xf32>
    %c0_13 = arith.constant 0 : index
    %c0_14 = arith.constant 0 : index
    %32 = vector.load %arg4[%c0_13, %c0_14] : memref<1x128xf32, #tpu.memory_space<vmem>>, vector<1x128xf32>
    %33 = vector.broadcast %32 : vector<1x128xf32> to vector<16x128xf32>
    %34 = arith.addf %31, %33 : vector<16x128xf32>
    %c128_i32 = arith.constant 128 : i32
    %35 = arith.muli %arg1, %c128_i32 : i32
    %36 = tpu.assume_multiple %35, 128 : i32
    %c0_15 = arith.constant 0 : index
    %37 = arith.index_cast %36 : i32 to index
    %38 = vector.load %arg2[%c0_15, %37] : memref<16x128xf32, #tpu.memory_space<vmem>>, vector<16x128xf32>
    %39 = arith.addf %38, %34 : vector<16x128xf32>
    %c0_16 = arith.constant 0 : index
    %c0_17 = arith.constant 0 : index
    %40 = vector.load %arg7[%c0_16, %c0_17] : memref<16x128xf32, #tpu.memory_space<vmem>>, vector<16x128xf32>
    tpu.vector_store %arg7[%c0_16, %c0_17], %39 {strides = array<i32>} : memref<16x128xf32, #tpu.memory_space<vmem>>, vector<16x128xf32>,
    return
  }
  func.func @transform_0(%arg0: i32, %arg1: i32) -> (i32, i32) {
    %c0_i32 = arith.constant 0 : i32
    %c0_i32_0 = arith.constant 0 : i32
    return %arg0, %c0_i32 : i32, i32
  }
  func.func @transform_1(%arg0: i32, %arg1: i32) -> (i32, i32) {
    %c0_i32 = arith.constant 0 : i32
    %c0_i32_0 = arith.constant 0 : i32
    return %c0_i32, %arg1 : i32, i32
  }
  func.func @transform_2(%arg0: i32, %arg1: i32) -> (i32, i32) {
    %c0_i32 = arith.constant 0 : i32
    %c0_i32_0 = arith.constant 0 : i32
    return %c0_i32, %arg1 : i32, i32
  }
  func.func @transform_3(%arg0: i32, %arg1: i32) -> (i32, i32) {
    %c0_i32 = arith.constant 0 : i32
    %c0_i32_0 = arith.constant 0 : i32
    %c0_i32_1 = arith.constant 0 : i32
    return %c0_i32, %c0_i32_0 : i32, i32
  }
  func.func @transform_4(%arg0: i32, %arg1: i32) -> (i32, i32) {
    %c0_i32 = arith.constant 0 : i32
    %c0_i32_0 = arith.constant 0 : i32
    %c0_i32_1 = arith.constant 0 : i32
    return %c0_i32, %c0_i32_0 : i32, i32
  }
  func.func @transform_5(%arg0: i32, %arg1: i32) -> (i32, i32) {
    %c0_i32 = arith.constant 0 : i32
    return %arg0, %arg1 : i32, i32
  }
}

</mosaic_0001>

<bundles_post_ra>
// kernel: tpu_custom_call.1
= control target key start
LH: loop header
LB: loop body
LE: loop exit
PB: predicated region body
PF: predicated region fallthrough
CT: control target
= control target key end

     0   :  { %10 = vsyncpa [#allocation3], 0  ;;  %s439_s0 = inlined_call_operand.hbm [shape: f32[16,128], index: 0, kind: input, shape index: {}, may-alias: {0,5}]   ;;  %s440_s1 = inlined_call_operand.hbm [shape: bf16[128,128], index: 1, kind: input, shape index: {}]   ;;  %s441_s2 = inlined_call_operand.vmem [shape: f32[1,128], index: 2, kind: input, shape index: {}]   ;;  %s442_s3 = inlined_call_operand.vmem [shape: f32[1,128], index: 3, kind: input, shape index: {}]   ;;  %s443_s4 = inlined_call_operand.vmem [shape: f32[1,128], index: 4, kind: input, shape index: {}]   ;;  %s444_s5 = inlined_call_operand.hbm [shape: f32[16,128], index: 5, kind: output, shape index: {}, may-alias: {0,5}]  }
   0x1   :  { %11 = vsyncpa [#allocation6], 0 }
   0x2   :  { %12 = vsyncpa [#allocation4], 0  ;;  %s17_s20 = sshll.u32 %s439_s0, 4  ;;  %s368_s21 = smov [#allocation2]   ;;  %s18_s20 = int_to_ptr.hbm [resolvable:$true] %s17_s20 }
   0x3   :  { %s19_s22 = sshll.u32 %s368_s21, 4  ;;  %s30_s25 = sshll.u32 %s440_s1, 4  ;;  %s20_s22 = int_to_ptr.vmem [resolvable:$true] %s19_s22  ;;  %s31_s25 = int_to_ptr.hbm [resolvable:$true] %s30_s25 }
   0x4   :  { %s369_s26 = smov 128   ;;  %s370_s27 = smov 8  }
   0x5   :  { %25 = dma.hbm_to_vmem [thread:$0]  %s18_s20, 256, %s20_s22, [#allocation3], %s369_s26, %s369_s26, %s370_s27  }
   0x6   :  { %s371_s28 = smov [#allocation5]   ;;  %s372_s30 = smov 64  }
   0x7   :  { %s32_s29 = sshll.u32 %s371_s28, 4  ;;  %s373_s0 = smov 4   ;;  %s33_s29 = int_to_ptr.vmem [resolvable:$true] %s32_s29 }
   0x8   :  { %38 = dma.hbm_to_vmem [thread:$0]  %s31_s25, 1024, %s33_s29, [#allocation6], %s372_s30, %s372_s30, %s373_s0  }
   0x9   :  { %362 = dma.done.wait [#allocation3], 256  }
   0xa   :  { %363 = vsyncadd [#allocation3], 4294967040 }
   0xb   :  { %364 = dma.done.wait [#allocation6], 1024  }
   0xc   :  { %365 = vsyncadd [#allocation6], 4294966272  ;;  %v414_v0 = vld [vmem:[#allocation2] sm:$0xff]  ;;  %v417_v1 = vld [vmem:[#allocation2 + $0x8] sm:$0xff]  ;;  %v61_v2 = vlaneseq }
   0xd   :  { %55 = vadd.xlane.f32.xlu0 %v414_v0  ;;  %v271_v14 = vld [vmem:[#allocation5 + $0x38] sm:$0xff]  ;;  %v270_v15 = vld [vmem:[#allocation5 + $0x30] sm:$0xff]  ;;  %v269_v16 = vld [vmem:[#allocation5 + $0x28] sm:$0xff] }
   0xe   :  { %v62_v3 = vand.u32 127, %v61_v2  ;;  %187 = vmatpush.bf16.msra.mxu0 %v271_v14  ;;  %v268_v17 = vld [vmem:[#allocation5 + $0x20] sm:$0xff]  ;;  %v267_v18 = vld [vmem:[#allocation5 + $0x18] sm:$0xff]  ;;  %v266_v21 = vld [vmem:[#allocation5 + $0x10] sm:$0xff] }
   0xf   :  { %v265_v22 = vld [vmem:[#allocation5 + $0x8] sm:$0xff]  ;;  %v264_v27 = vld [vmem:[#allocation5] sm:$0xff]  ;;  %v279_v50 = vld [vmem:[%s442_s3] ss:$0 sm:$0xff]  ;;  %s374_s3 = smov [#allocation7]  }
  0x10   :  { %vm63_vm0 = vcmp.lt.s32.totalorder %v62_v3, 32  ;;  %v280_v54 = vld [vmem:[%s443_s4] ss:$0 sm:$0xff]  ;;  %s215_s11 = sshll.u32 %s374_s3, 4  ;;  %s217_s4 = sshll.u32 %s444_s5, 4  ;;  %s216_s11 = int_to_ptr.vmem [resolvable:$true] %s215_s11  ;;  %s218_s4 = int_to_ptr.hbm [resolvable:$true] %s217_s4 }
  0x11   :  { %v281_v59 = vld [vmem:[%s441_s2] ss:$0 sm:$0xff] }
  0x12   :  { %188 = vmatpush.bf16.msra.mxu0 %v270_v15 }
  0x15   :  { %57 = vadd.xlane.f32.xlu0 %v417_v1 }
  0x16   :  { %189 = vmatpush.bf16.msra.mxu0 %v269_v16 }
  0x1a   :  { %190 = vmatpush.bf16.msra.mxu0 %v268_v17 }
  0x1e   :  { %191 = vmatpush.bf16.msra.mxu0 %v267_v18 }
  0x22   :  { %192 = vmatpush.bf16.msra.mxu0 %v266_v21 }
  0x26   :  { %193 = vmatpush.bf16.msra.mxu0 %v265_v22 }
  0x2a   :  { %194 = vmatpush.bf16.msra.mxu0 %v264_v27 }
  0x80   :  { %v56_v4 = vpop.xlane.xlu0 %55 }
  0x81   :  { %v59_v5 = vmul.f32 0.03125, %v56_v4 }
  0x83   :  { %v64_v6 = vsub.f32 %v414_v0, %v59_v5 }
  0x85   :  { %v66_v7 = vsel %vm63_vm0, %v64_v6, 0.0 }
  0x86   :  { %v68_v8 = vmul.f32 %v66_v7, %v66_v7 }
  0x88   :  { %70 = vadd.xlane.f32.xlu1 %v68_v8  ;;  %v58_v9 = vpop.xlane.xlu0 %57 }
  0x89   :  { %v60_v10 = vmul.f32 0.03125, %v58_v9 }
  0x8b   :  { %v65_v11 = vsub.f32 %v417_v1, %v60_v10 }
  0x8d   :  { %v67_v12 = vsel %vm63_vm0, %v65_v11, 0.0 }
  0x8e   :  { %v69_v13 = vmul.f32 %v67_v12, %v67_v12 }
  0x90   :  { %72 = vadd.xlane.f32.xlu1 %v69_v13 }
  0xfb   :  { %v71_v19 = vpop.xlane.xlu1 %70 }
  0xfc   :  { %v74_v20 = vmul.f32 0.032258064, %v71_v19 }
  0xfe   :  { %282 = vrsqrt.f32 %v74_v20  ;;  %vm83_vm1 = vcmp.eq.f32.partialorder %v74_v20, inf  ;;  %v86_v36 = vand.u32 2147483648, %v74_v20  ;;  %vm85_vm2 = vcmp.eq.f32.partialorder %v74_v20, 0.0 }
 0x103   :  { %v73_v23 = vpop.xlane.xlu1 %72 }
 0x104   :  { %v283_v24 = vpop.eup %282  ;;  %v75_v25 = vmul.f32 0.032258064, %v73_v23 }
 0x105   :  { %v77_v26 = vmul.f32 %v283_v24, %v74_v20 }
 0x106   :  { %284 = vrsqrt.f32 %v75_v25  ;;  %vm95_vm3 = vcmp.eq.f32.partialorder %v75_v25, inf  ;;  %v98_v44 = vand.u32 2147483648, %v75_v25  ;;  %vm97_vm4 = vcmp.eq.f32.partialorder %v75_v25, 0.0 }
 0x107   :  { %v78_v28 = vmul.f32 %v283_v24, %v77_v26 }
 0x109   :  { %v79_v29 = vmul.f32 0.5, %v78_v28 }
 0x10b   :  { %v80_v30 = vsub.f32 1.5, %v79_v29 }
 0x10c   :  { %v285_v31 = vpop.eup %284 }
 0x10d   :  { %v89_v32 = vmul.f32 %v285_v31, %v75_v25  ;;  %v81_v33 = vmul.f32 %v283_v24, %v80_v30 }
 0x10f   :  { %v90_v34 = vmul.f32 %v285_v31, %v89_v32  ;;  %v82_v35 = vmul.f32 %v81_v33, %v74_v20 }
 0x111   :  { %v84_v37 = vsel %vm83_vm1, %v74_v20, %v82_v35  ;;  %v91_v38 = vmul.f32 0.5, %v90_v34 }
 0x112   :  { %v87_v39 = vsel %vm85_vm2, %v86_v36, %v84_v37 }
 0x113   :  { %v92_v40 = vsub.f32 1.5, %v91_v38  ;;  %v100_v41 = vadd.f32 1e-06, %v87_v39 }
 0x115   :  { %v93_v42 = vmul.f32 %v285_v31, %v92_v40  ;;  %286 = vrcp.f32 %v100_v41 }
 0x117   :  { %v94_v43 = vmul.f32 %v93_v42, %v75_v25 }
 0x119   :  { %v96_v45 = vsel %vm95_vm3, %v75_v25, %v94_v43 }
 0x11a   :  { %v99_v46 = vsel %vm97_vm4, %v98_v44, %v96_v45 }
 0x11b   :  { %v101_v47 = vadd.f32 1e-06, %v99_v46  ;;  %v287_v48 = vpop.eup %286 }
 0x11c   :  { %v105_v49 = vmul.f32 %v287_v48, %v66_v7 }
 0x11d   :  { %288 = vrcp.f32 %v101_v47 }
 0x11e   :  { %v110_v53 = vmul.f32 %v279_v50, %v105_v49 }
 0x120   :  { %v116_v56 = vadd.f32 %v280_v54, %v110_v53 }
 0x123   :  { %v289_v51 = vpop.eup %288 }
 0x124   :  { %v106_v52 = vmul.f32 %v289_v51, %v67_v12 }
 0x126   :  { %v111_v55 = vmul.f32 %v279_v50, %v106_v52 }
 0x128   :  { %v117_v57 = vadd.f32 %v280_v54, %v111_v55 }
 0x12a   :  { %v118_v58 = vpack.c.bf16 %v117_v57, %v116_v56 }
 0x12c   :  { %195 = vmatmul.bf16.vlgmr.msra.gmra.mxu0 %v118_v58 }
 0x1a9   :  { %v196_v60 = vpop.f32.mrf.mxu0 }
 0x1aa   :  { %v197_v61 = vadd.f32 %v281_v59, %v196_v60 }
 0x1ac   :  { %v207_v62 = vadd.f32 %v197_v61, %v414_v0 }
 0x1ae   :  { %209 = vst [vmem:[#allocation7] sm:$0xff] %v207_v62 }
 0x1b1   :  { %v198_v63 = vpop.f32.mrf.mxu0 }
 0x1b2   :  { %v199_v2 = vadd.f32 %v281_v59, %v198_v63 }
 0x1b4   :  { %v208_v3 = vadd.f32 %v199_v2, %v417_v1 }
 0x1b6   :  { %210 = vst [vmem:[#allocation7 + $0x8] sm:$0xff] %v208_v3 }
 0x1b7   :  { %223 = dma.vmem_to_hbm [thread:$0]  %s216_s11, 256, %s218_s4, [#allocation4], %s369_s26, %s369_s26, %s370_s27  }
 0x1b8   :  { %366 = dma.done.wait [#allocation4], 256  }
 0x1b9   :  { %367 = vsyncadd [#allocation4], 4294967040 }
 0x1ba   :  { %228 = vsyncpa [#allocation3], 1 }
 0x1bb   :  { %229 = vsyncpa [#allocation6], 1 }
 0x1bc   :  { %230 = vsyncpa [#allocation4], 1 }

// kernel: tpu_custom_call.1
= control target key start
LH: loop header
LB: loop body
LE: loop exit
PB: predicated region body
PF: predicated region fallthrough
CT: control target
= control target key end

     0   :  { %10 = vsyncpa [#allocation3], 0  ;;  %s439_s0 = inlined_call_operand.hbm [shape: f32[16,128], index: 0, kind: input, shape index: {}, may-alias: {0,5}]   ;;  %s440_s1 = inlined_call_operand.hbm [shape: bf16[128,128], index: 1, kind: input, shape index: {}]   ;;  %s441_s2 = inlined_call_operand.vmem [shape: f32[1,128], index: 2, kind: input, shape index: {}]   ;;  %s442_s3 = inlined_call_operand.vmem [shape: f32[1,128], index: 3, kind: input, shape index: {}]   ;;  %s443_s4 = inlined_call_operand.vmem [shape: f32[1,128], index: 4, kind: input, shape index: {}]   ;;  %s444_s5 = inlined_call_operand.hbm [shape: f32[16,128], index: 5, kind: output, shape index: {}, may-alias: {0,5}]  }
   0x1   :  { %11 = vsyncpa [#allocation6], 0 }
   0x2   :  { %12 = vsyncpa [#allocation4], 0  ;;  %s17_s20 = sshll.u32 %s439_s0, 4  ;;  %s368_s21 = smov [#allocation2]   ;;  %s18_s20 = int_to_ptr.hbm [resolvable:$true] %s17_s20 }
   0x3   :  { %s19_s22 = sshll.u32 %s368_s21, 4  ;;  %s30_s25 = sshll.u32 %s440_s1, 4  ;;  %s20_s22 = int_to_ptr.vmem [resolvable:$true] %s19_s22  ;;  %s31_s25 = int_to_ptr.hbm [resolvable:$true] %s30_s25 }
   0x4   :  { %s369_s26 = smov 128   ;;  %s370_s27 = smov 8  }
   0x5   :  { %25 = dma.hbm_to_vmem [thread:$0]  %s18_s20, 256, %s20_s22, [#allocation3], %s369_s26, %s369_s26, %s370_s27  }
   0x6   :  { %s371_s28 = smov [#allocation5]   ;;  %s372_s30 = smov 64  }
   0x7   :  { %s32_s29 = sshll.u32 %s371_s28, 4  ;;  %s373_s0 = smov 4   ;;  %s33_s29 = int_to_ptr.vmem [resolvable:$true] %s32_s29 }
   0x8   :  { %38 = dma.hbm_to_vmem [thread:$0]  %s31_s25, 1024, %s33_s29, [#allocation6], %s372_s30, %s372_s30, %s373_s0  }
   0x9   :  { %362 = dma.done.wait [#allocation3], 256  }
   0xa   :  { %363 = vsyncadd [#allocation3], 4294967040 }
   0xb   :  { %364 = dma.done.wait [#allocation6], 1024  }
   0xc   :  { %365 = vsyncadd [#allocation6], 4294966272  ;;  %v414_v0 = vld [vmem:[#allocation2] sm:$0xff]  ;;  %v417_v1 = vld [vmem:[#allocation2 + $0x8] sm:$0xff]  ;;  %v61_v2 = vlaneseq }
   0xd   :  { %55 = vadd.xlane.f32.xlu0 %v414_v0  ;;  %v271_v14 = vld [vmem:[#allocation5 + $0x38] sm:$0xff]  ;;  %v270_v15 = vld [vmem:[#allocation5 + $0x30] sm:$0xff]  ;;  %v269_v16 = vld [vmem:[#allocation5 + $0x28] sm:$0xff] }
   0xe   :  { %v62_v3 = vand.u32 127, %v61_v2  ;;  %187 = vmatpush.bf16.msra.mxu0 %v271_v14  ;;  %v268_v17 = vld [vmem:[#allocation5 + $0x20] sm:$0xff]  ;;  %v267_v18 = vld [vmem:[#allocation5 + $0x18] sm:$0xff]  ;;  %v266_v21 = vld [vmem:[#allocation5 + $0x10] sm:$0xff] }
   0xf   :  { %v265_v22 = vld [vmem:[#allocation5 + $0x8] sm:$0xff]  ;;  %v264_v27 = vld [vmem:[#allocation5] sm:$0xff]  ;;  %v279_v50 = vld [vmem:[%s442_s3] ss:$0 sm:$0xff]  ;;  %s374_s3 = smov [#allocation7]  }
  0x10   :  { %vm63_vm0 = vcmp.lt.s32.totalorder %v62_v3, 32  ;;  %v280_v54 = vld [vmem:[%s443_s4] ss:$0 sm:$0xff]  ;;  %s215_s11 = sshll.u32 %s374_s3, 4  ;;  %s217_s4 = sshll.u32 %s444_s5, 4  ;;  %s216_s11 = int_to_ptr.vmem [resolvable:$true] %s215_s11  ;;  %s218_s4 = int_to_ptr.hbm [resolvable:$true] %s217_s4 }
  0x11   :  { %v281_v59 = vld [vmem:[%s441_s2] ss:$0 sm:$0xff] }
  0x12   :  { %188 = vmatpush.bf16.msra.mxu0 %v270_v15 }
  0x15   :  { %57 = vadd.xlane.f32.xlu0 %v417_v1 }
  0x16   :  { %189 = vmatpush.bf16.msra.mxu0 %v269_v16 }
  0x1a   :  { %190 = vmatpush.bf16.msra.mxu0 %v268_v17 }
  0x1e   :  { %191 = vmatpush.bf16.msra.mxu0 %v267_v18 }
  0x22   :  { %192 = vmatpush.bf16.msra.mxu0 %v266_v21 }
  0x26   :  { %193 = vmatpush.bf16.msra.mxu0 %v265_v22 }
  0x2a   :  { %194 = vmatpush.bf16.msra.mxu0 %v264_v27 }
  0x80   :  { %v56_v4 = vpop.xlane.xlu0 %55 }
  0x81   :  { %v59_v5 = vmul.f32 0.03125, %v56_v4 }
  0x83   :  { %v64_v6 = vsub.f32 %v414_v0, %v59_v5 }
  0x85   :  { %v66_v7 = vsel %vm63_vm0, %v64_v6, 0.0 }
  0x86   :  { %v68_v8 = vmul.f32 %v66_v7, %v66_v7 }
  0x88   :  { %70 = vadd.xlane.f32.xlu1 %v68_v8  ;;  %v58_v9 = vpop.xlane.xlu0 %57 }
  0x89   :  { %v60_v10 = vmul.f32 0.03125, %v58_v9 }
  0x8b   :  { %v65_v11 = vsub.f32 %v417_v1, %v60_v10 }
  0x8d   :  { %v67_v12 = vsel %vm63_vm0, %v65_v11, 0.0 }
  0x8e   :  { %v69_v13 = vmul.f32 %v67_v12, %v67_v12 }
  0x90   :  { %72 = vadd.xlane.f32.xlu1 %v69_v13 }
  0xfb   :  { %v71_v19 = vpop.xlane.xlu1 %70 }
  0xfc   :  { %v74_v20 = vmul.f32 0.032258064, %v71_v19 }
  0xfe   :  { %282 = vrsqrt.f32 %v74_v20  ;;  %vm83_vm1 = vcmp.eq.f32.partialorder %v74_v20, inf  ;;  %v86_v36 = vand.u32 2147483648, %v74_v20  ;;  %vm85_vm2 = vcmp.eq.f32.partialorder %v74_v20, 0.0 }
 0x103   :  { %v73_v23 = vpop.xlane.xlu1 %72 }
 0x104   :  { %v283_v24 = vpop.eup %282  ;;  %v75_v25 = vmul.f32 0.032258064, %v73_v23 }
 0x105   :  { %v77_v26 = vmul.f32 %v283_v24, %v74_v20 }
 0x106   :  { %284 = vrsqrt.f32 %v75_v25  ;;  %vm95_vm3 = vcmp.eq.f32.partialorder %v75_v25, inf  ;;  %v98_v44 = vand.u32 2147483648, %v75_v25  ;;  %vm97_vm4 = vcmp.eq.f32.partialorder %v75_v25, 0.0 }
 0x107   :  { %v78_v28 = vmul.f32 %v283_v24, %v77_v26 }
 0x109   :  { %v79_v29 = vmul.f32 0.5, %v78_v28 }
 0x10b   :  { %v80_v30 = vsub.f32 1.5, %v79_v29 }
 0x10c   :  { %v285_v31 = vpop.eup %284 }
 0x10d   :  { %v89_v32 = vmul.f32 %v285_v31, %v75_v25  ;;  %v81_v33 = vmul.f32 %v283_v24, %v80_v30 }
 0x10f   :  { %v90_v34 = vmul.f32 %v285_v31, %v89_v32  ;;  %v82_v35 = vmul.f32 %v81_v33, %v74_v20 }
 0x111   :  { %v84_v37 = vsel %vm83_vm1, %v74_v20, %v82_v35  ;;  %v91_v38 = vmul.f32 0.5, %v90_v34 }
 0x112   :  { %v87_v39 = vsel %vm85_vm2, %v86_v36, %v84_v37 }
 0x113   :  { %v92_v40 = vsub.f32 1.5, %v91_v38  ;;  %v100_v41 = vadd.f32 1e-06, %v87_v39 }
 0x115   :  { %v93_v42 = vmul.f32 %v285_v31, %v92_v40  ;;  %286 = vrcp.f32 %v100_v41 }
 0x117   :  { %v94_v43 = vmul.f32 %v93_v42, %v75_v25 }
 0x119   :  { %v96_v45 = vsel %vm95_vm3, %v75_v25, %v94_v43 }
 0x11a   :  { %v99_v46 = vsel %vm97_vm4, %v98_v44, %v96_v45 }
 0x11b   :  { %v101_v47 = vadd.f32 1e-06, %v99_v46  ;;  %v287_v48 = vpop.eup %286 }
 0x11c   :  { %v105_v49 = vmul.f32 %v287_v48, %v66_v7 }
 0x11d   :  { %288 = vrcp.f32 %v101_v47 }
 0x11e   :  { %v110_v53 = vmul.f32 %v279_v50, %v105_v49 }
 0x120   :  { %v116_v56 = vadd.f32 %v280_v54, %v110_v53 }
 0x123   :  { %v289_v51 = vpop.eup %288 }
 0x124   :  { %v106_v52 = vmul.f32 %v289_v51, %v67_v12 }
 0x126   :  { %v111_v55 = vmul.f32 %v279_v50, %v106_v52 }
 0x128   :  { %v117_v57 = vadd.f32 %v280_v54, %v111_v55 }
 0x12a   :  { %v118_v58 = vpack.c.bf16 %v117_v57, %v116_v56 }
 0x12c   :  { %195 = vmatmul.bf16.vlgmr.msra.gmra.mxu0 %v118_v58 }
 0x1a9   :  { %v196_v60 = vpop.f32.mrf.mxu0 }
 0x1aa   :  { %v197_v61 = vadd.f32 %v281_v59, %v196_v60 }
 0x1ac   :  { %v207_v62 = vadd.f32 %v197_v61, %v414_v0 }
 0x1ae   :  { %209 = vst [vmem:[#allocation7] sm:$0xff] %v207_v62 }
 0x1b1   :  { %v198_v63 = vpop.f32.mrf.mxu0 }
 0x1b2   :  { %v199_v2 = vadd.f32 %v281_v59, %v198_v63 }
 0x1b4   :  { %v208_v3 = vadd.f32 %v199_v2, %v417_v1 }
 0x1b6   :  { %210 = vst [vmem:[#allocation7 + $0x8] sm:$0xff] %v208_v3 }
 0x1b7   :  { %223 = dma.vmem_to_hbm [thread:$0]  %s216_s11, 256, %s218_s4, [#allocation4], %s369_s26, %s369_s26, %s370_s27  }
 0x1b8   :  { %366 = dma.done.wait [#allocation4], 256  }
 0x1b9   :  { %367 = vsyncadd [#allocation4], 4294967040 }
 0x1ba   :  { %228 = vsyncpa [#allocation3], 1 }
 0x1bb   :  { %229 = vsyncpa [#allocation6], 1 }
 0x1bc   :  { %230 = vsyncpa [#allocation4], 1 }

</bundles_post_ra>
